<compile_context>
chip_gen: v6e
topology: v6e:2x2x1
jax: 0.10.0
libtpu: 0.0.40
codegen_flags: <defaults>
</compile_context>

<pallas_src>
import jax
import jax.numpy as jnp
from jax.experimental import pallas as pl
from jax.experimental.pallas import tpu as pltpu


def _attn_kernel(h_ref, e_ref, wh_ref, we_ref, b_ref, v_ref, vb_ref, o_ref):
    # h_ref : (BS_TILE, d)        hidden states (batch-first), matmul dtype
    # e_ref : (BS_TILE, w, d)     encoded features (batch-first), matmul dtype
    # wh_ref: (d, d)              attn.weight[:, :d].T   (hidden half)
    # we_ref: (d, d)              attn.weight[:, d:].T   (encoded half)
    # b_ref : (1, d)              attn.bias (f32)
    # v_ref : (1, d)              w_v.weight (lane-dense row, f32)
    # vb_ref: (1, 1)              w_v.bias (f32)
    # o_ref : (BS_TILE, w)        softmaxed attention weights (f32)
    bs_t, w_len, d = e_ref.shape

    # hidden projection: (BS_TILE, d) @ (d, d), f32 accumulation on the MXU.
    hproj = jnp.dot(h_ref[...], wh_ref[...], preferred_element_type=jnp.float32)

    # encoded projection with M = BS_TILE * w (fills the MXU M dimension).
    e2d = e_ref[...].reshape(bs_t * w_len, d)
    eproj = jnp.dot(e2d, we_ref[...], preferred_element_type=jnp.float32)
    eproj = eproj.reshape(bs_t, w_len, d)

    # corr = tanh(e @ W_e + h @ W_h + b)   (hproj broadcast over w; EUP tanh)
    corr = jnp.tanh(eproj + hproj[:, None, :] + b_ref[0])

    # scores: VPU multiply + lane reduce against the lane-dense v row,
    # then the (irrelevant-to-softmax but semantics-preserving) bias add.
    scores = jnp.sum(corr * v_ref[0], axis=-1) + vb_ref[...]        # (BS_TILE, w)

    # softmax over w (lane axis); denominator via EUP approximate reciprocal.
    m = jnp.max(scores, axis=-1, keepdims=True)
    p = jnp.exp(scores - m)
    denom = jnp.sum(p, axis=-1, keepdims=True)
    o_ref[...] = (p * pl.reciprocal(denom, approx=True)).astype(o_ref.dtype)


def _round_up(x, m):
    return (x + m - 1) // m * m


def _pick_bs_tile(bs, w, d_pad, itemsize):
    """Pick a batch tile: big enough to fill the MXU, small enough for VMEM
    (v7x has 64 MiB), and leaving >= 2 grid steps so both v7x TCs get work."""
    budget = 24 * 1024 * 1024                      # conservative working set
    weights = 2 * 2 * d_pad * d_pad * itemsize     # W_h + W_e, worst-case x2 buf
    bs_tile = 8
    for cand in (16, 32, 64):
        act = 2 * cand * (w + 1) * d_pad * itemsize   # double-buffered h + e tiles
        f32_tmp = cand * w * (d_pad + 4) * 4          # f32 intermediates
        if bs >= 2 * cand and weights + act + f32_tmp <= budget:
            bs_tile = cand
    return bs_tile


def attention_layer(hidden_states, encoded_features, attn_w, attn_b, wv_w, wv_b,
                    *, matmul_dtype=jnp.bfloat16, bs_tile=None):
    """
    hidden_states:    (1, bs, d_model)   float32
    encoded_features: (w, bs, d_model)   float32
    attn_w: (d_model, 2*d_model)  attn_b: (d_model,)   (PyTorch Linear layout)
    wv_w:   (1, d_model)          wv_b:   (1,)
    returns: (bs, 1, w) float32
    """
    w, bs, d = encoded_features.shape
    assert hidden_states.shape == (1, bs, d)

    d_pad = _round_up(d, 128)                      # full-width lanes / MXU columns

    # --- batch-first activations, feature axis zero-padded to a lane multiple ---
    h_bf = hidden_states[0]                              # (bs, d)
    e_bf = jnp.transpose(encoded_features, (1, 0, 2))    # (bs, w, d)
    if d_pad != d:
        h_bf = jnp.pad(h_bf, ((0, 0), (0, d_pad - d)))
        e_bf = jnp.pad(e_bf, ((0, 0), (0, 0), (0, d_pad - d)))

    # --- split the concat matmul: cat([h, e]) @ attn_w.T == h @ W_h + e @ W_e ---
    w_h = attn_w[:, :d].T                                # (d, d)
    w_e = attn_w[:, d:].T                                # (d, d)
    if d_pad != d:
        w_h = jnp.pad(w_h, ((0, d_pad - d), (0, d_pad - d)))
        w_e = jnp.pad(w_e, ((0, d_pad - d), (0, d_pad - d)))
    b = jnp.pad(attn_b, (0, d_pad - d)).reshape(1, d_pad).astype(jnp.float32)
    v = jnp.pad(wv_w[0], (0, d_pad - d)).reshape(1, d_pad).astype(jnp.float32)
    vb = wv_b.reshape(1, 1).astype(jnp.float32)

    h_bf = h_bf.astype(matmul_dtype)
    e_bf = e_bf.astype(matmul_dtype)
    w_h = w_h.astype(matmul_dtype)
    w_e = w_e.astype(matmul_dtype)

    # --- batch tiling (pad batch up to a tile multiple; padded rows sliced off) ---
    if bs_tile is None:
        bs_tile = _pick_bs_tile(bs, w, d_pad, jnp.dtype(matmul_dtype).itemsize)
    bs_pad = _round_up(max(bs, bs_tile), bs_tile)
    if bs_pad != bs:
        h_bf = jnp.pad(h_bf, ((0, bs_pad - bs), (0, 0)))
        e_bf = jnp.pad(e_bf, ((0, bs_pad - bs), (0, 0), (0, 0)))

    grid = (bs_pad // bs_tile,)

    out2d = pl.pallas_call(
        _attn_kernel,
        out_shape=jax.ShapeDtypeStruct((bs_pad, w), jnp.float32),
        grid_spec=pltpu.PrefetchScalarGridSpec(
            num_scalar_prefetch=0,
            grid=grid,
            in_specs=[
                pl.BlockSpec((bs_tile, d_pad), lambda i: (i, 0)),        # hidden
                pl.BlockSpec((bs_tile, w, d_pad), lambda i: (i, 0, 0)),  # encoded
                pl.BlockSpec((d_pad, d_pad), lambda i: (0, 0)),          # W_h
                pl.BlockSpec((d_pad, d_pad), lambda i: (0, 0)),          # W_e
                pl.BlockSpec((1, d_pad), lambda i: (0, 0)),              # attn bias
                pl.BlockSpec((1, d_pad), lambda i: (0, 0)),              # w_v row
                pl.BlockSpec((1, 1), lambda i: (0, 0)),                  # w_v bias
            ],
            out_specs=pl.BlockSpec((bs_tile, w), lambda i: (i, 0)),
        ),
        compiler_params=pltpu.CompilerParams(
            dimension_semantics=("parallel",),       # megacore / 2x TC on v7x
            vmem_limit_bytes=48 * 1024 * 1024,       # raise v5e/v6e default, <64MiB v7x
        ),
    )(h_bf, e_bf, w_h, w_e, b, v, vb)

    # plain-JAX glue: drop batch padding, restore (bs, 1, w)
    return out2d[:bs].reshape(bs, 1, w)


def _reference(hidden_states, encoded_features, attn_w, attn_b, wv_w, wv_b):
    w = encoded_features.shape[0]
    h = jnp.broadcast_to(hidden_states, (w,) + hidden_states.shape[1:])
    cat = jnp.concatenate([h, encoded_features], axis=-1)
    corr = jnp.tanh(cat @ attn_w.T + attn_b)
    score = corr @ wv_w.T + wv_b                    # (w, bs, 1)
    score = jnp.transpose(score, (1, 2, 0))         # (bs, 1, w)
    return jax.nn.softmax(score, axis=-1)


def _make_inputs(key, d_model, bs, w):
    k1, k2, k3, k4, k5, k6 = jax.random.split(key, 6)
    hidden_states = jax.random.normal(k1, (1, bs, d_model), dtype=jnp.float32)
    encoded_features = jax.random.normal(k2, (w, bs, d_model), dtype=jnp.float32)
    attn_w = jax.random.normal(k3, (d_model, 2 * d_model), dtype=jnp.float32) * 0.1
    attn_b = jax.random.normal(k4, (d_model,), dtype=jnp.float32) * 0.1
    wv_w = jax.random.normal(k5, (1, d_model), dtype=jnp.float32) * 0.1
    wv_b = jax.random.normal(k6, (1,), dtype=jnp.float32) * 0.1
    return hidden_states, encoded_features, attn_w, attn_b, wv_w, wv_b


if __name__ == "__main__":
    key = jax.random.PRNGKey(0)
    key_main, key_odd = jax.random.split(key)

    # Main shapes: lane-aligned d, >=2 grid steps, MXU M = bs_tile * w = 128.
    d_model, bs, w = 128, 16, 16
    args = _make_inputs(key_main, d_model, bs, w)
    ref = _reference(*args)

    # f32 matmul path (only deviation from the f32 reference is the EUP
    # approximate reciprocal in the softmax normalizer, ~1e-4 relative).
    out_f32 = jax.block_until_ready(attention_layer(*args, matmul_dtype=jnp.float32))
    assert out_f32.shape == (bs, 1, w)
    assert jnp.allclose(out_f32, ref, atol=1e-3, rtol=1e-3)

    # bf16 matmul path (f32 accumulation, f32 tanh/softmax) for v6e/v7x MXU.
    out_bf16 = jax.block_until_ready(attention_layer(*args, matmul_dtype=jnp.bfloat16))
    assert out_bf16.shape == (bs, 1, w)
    assert jnp.allclose(out_bf16, ref, atol=2e-2, rtol=2e-2)

    # Odd / unaligned shapes (exercise d- and batch-padding paths).
    d2, bs2, w2 = 32, 2, 8
    args2 = _make_inputs(key_odd, d2, bs2, w2)
    ref2 = _reference(*args2)
    out2 = jax.block_until_ready(attention_layer(*args2, matmul_dtype=jnp.float32))
    assert out2.shape == (bs2, 1, w2)
    assert jnp.allclose(out2, ref2, atol=1e-3, rtol=1e-3)

    print("KERNEL_OK")
</pallas_src>

<mosaic_0001>
module attributes {stable_mosaic.version = 11 : i64} {
  func.func @_attn_kernel(%arg0: i32, %arg1: memref<8x128xf32, #tpu.memory_space<vmem>>, %arg2: memref<8x16x128xf32, #tpu.memory_space<vmem>>, %arg3: memref<128x128xf32, #tpu.memory_space<vmem>>, %arg4: memref<128x128xf32, #tpu.memory_space<vmem>>, %arg5: memref<1x128xf32, #tpu.memory_space<vmem>>, %arg6: memref<1x128xf32, #tpu.memory_space<vmem>>, %arg7: memref<1x1xf32, #tpu.memory_space<vmem>>, %arg8: memref<8x16xf32, #tpu.memory_space<vmem>>) attributes {dimension_semantics = [#tpu.dimension_semantics<parallel>], iteration_bounds = array<i64: 2>, scalar_prefetch = 0 : i64, scratch_operands = 0 : i64, tpu.core_type = #tpu.core_type<tc>, window_params = [{transform_indices = @transform_0, window_bounds = array<i64: 8, 128>}, {transform_indices = @transform_1, window_bounds = array<i64: 8, 16, 128>}, {pipeline_mode = #tpu.pipeline_mode<synchronous>, transform_indices = @transform_2, window_bounds = array<i64: 128, 128>}, {pipeline_mode = #tpu.pipeline_mode<synchronous>, transform_indices = @transform_3, window_bounds = array<i64: 128, 128>}, {pipeline_mode = #tpu.pipeline_mode<synchronous>, transform_indices = @transform_4, window_bounds = array<i64: 1, 128>}, {pipeline_mode = #tpu.pipeline_mode<synchronous>, transform_indices = @transform_5, window_bounds = array<i64: 1, 128>}, {pipeline_mode = #tpu.pipeline_mode<synchronous>, transform_indices = @transform_6, window_bounds = array<i64: 1, 1>}, {transform_indices = @transform_7, window_bounds = array<i64: 8, 16>}]} {
    %c0 = arith.constant 0 : index
    %c0_0 = arith.constant 0 : index
    %0 = vector.load %arg1[%c0, %c0_0] : memref<8x128xf32, #tpu.memory_space<vmem>>, vector<8x128xf32>
    %c0_1 = arith.constant 0 : index
    %c0_2 = arith.constant 0 : index
    %1 = vector.load %arg3[%c0_1, %c0_2] : memref<128x128xf32, #tpu.memory_space<vmem>>, vector<128x128xf32>
    %cst = arith.constant dense<0.000000e+00> : vector<8x128xf32>
    %2 = tpu.matmul %0, %1, %cst {dimension_numbers = #tpu.dot_dimension_numbers<[1], [0], [0], [1], [0, 0, 1, 1], [], []>} : vector<8x128xf32>, vector<128x128xf32>, vector<8x128xf32> -> vector<8x128xf32>
    %c0_3 = arith.constant 0 : index
    %c0_4 = arith.constant 0 : index
    %c0_5 = arith.constant 0 : index
    %3 = vector.load %arg2[%c0_3, %c0_4, %c0_5] : memref<8x16x128xf32, #tpu.memory_space<vmem>>, vector<8x16x128xf32>
    %4 = vector.shape_cast %3 : vector<8x16x128xf32> to vector<128x128xf32>
    %c0_6 = arith.constant 0 : index
    %c0_7 = arith.constant 0 : index
    %5 = vector.load %arg4[%c0_6, %c0_7] : memref<128x128xf32, #tpu.memory_space<vmem>>, vector<128x128xf32>
    %cst_8 = arith.constant dense<0.000000e+00> : vector<128x128xf32>
    %6 = tpu.matmul %4, %5, %cst_8 {dimension_numbers = #tpu.dot_dimension_numbers<[1], [0], [0], [1], [0, 0, 1, 1], [], []>} : vector<128x128xf32>, vector<128x128xf32>, vector<128x128xf32> -> vector<128x128xf32>
    %7 = vector.shape_cast %6 : vector<128x128xf32> to vector<8x16x128xf32>
    %8 = vector.shape_cast %2 : vector<8x128xf32> to vector<8x1x128xf32>
    %9 = vector.broadcast %8 : vector<8x1x128xf32> to vector<8x16x128xf32>
    %10 = arith.addf %7, %9 : vector<8x16x128xf32>
    %c0_9 = arith.constant 0 : index
    %c0_10 = arith.constant 0 : index
    %11 = vector.load %arg5[%c0_9, %c0_10] : memref<1x128xf32, #tpu.memory_space<vmem>>, vector<1x128xf32>
    %12 = vector.shape_cast %11 : vector<1x128xf32> to vector<128xf32>
    %13 = vector.shape_cast %12 : vector<128xf32> to vector<1x1x128xf32>
    %14 = vector.broadcast %13 : vector<1x1x128xf32> to vector<8x16x128xf32>
    %15 = arith.addf %10, %14 : vector<8x16x128xf32>
    %16 = math.tanh %15 : vector<8x16x128xf32>
    %c0_11 = arith.constant 0 : index
    %c0_12 = arith.constant 0 : index
    %17 = vector.load %arg6[%c0_11, %c0_12] : memref<1x128xf32, #tpu.memory_space<vmem>>, vector<1x128xf32>
    %18 = vector.shape_cast %17 : vector<1x128xf32> to vector<128xf32>
    %19 = vector.shape_cast %18 : vector<128xf32> to vector<1x1x128xf32>
    %20 = vector.broadcast %19 : vector<1x1x128xf32> to vector<8x16x128xf32>
    %21 = arith.mulf %16, %20 : vector<8x16x128xf32>
    %cst_13 = arith.constant dense<0.000000e+00> : vector<8x16xf32>
    %22 = vector.multi_reduction <add>, %21, %cst_13 [2] : vector<8x16x128xf32> to vector<8x16xf32>
    %c0_14 = arith.constant 0 : index
    %c0_15 = arith.constant 0 : index
    %23 = vector.load %arg7[%c0_14, %c0_15] : memref<1x1xf32, #tpu.memory_space<vmem>>, vector<1x1xf32>
    %24 = vector.broadcast %23 : vector<1x1xf32> to vector<8x16xf32>
    %25 = arith.addf %22, %24 : vector<8x16xf32>
    %cst_16 = arith.constant dense<0xFF800000> : vector<8xf32>
    %26 = vector.multi_reduction <maximumf>, %25, %cst_16 [1] : vector<8x16xf32> to vector<8xf32>
    %27 = vector.shape_cast %26 : vector<8xf32> to vector<8x1xf32>
    %28 = vector.broadcast %27 : vector<8x1xf32> to vector<8x16xf32>
    %29 = arith.subf %25, %28 : vector<8x16xf32>
    %30 = math.exp %29 : vector<8x16xf32>
    %cst_17 = arith.constant dense<0.000000e+00> : vector<8xf32>
    %31 = vector.multi_reduction <add>, %30, %cst_17 [1] : vector<8x16xf32> to vector<8xf32>
    %32 = vector.shape_cast %31 : vector<8xf32> to vector<8x1xf32>
    %33 = tpu.reciprocal %32 {approx = true} : vector<8x1xf32> -> vector<8x1xf32>
    %34 = vector.broadcast %33 : vector<8x1xf32> to vector<8x16xf32>
    %35 = arith.mulf %30, %34 : vector<8x16xf32>
    %c0_18 = arith.constant 0 : index
    %c0_19 = arith.constant 0 : index
    %36 = vector.load %arg8[%c0_18, %c0_19] : memref<8x16xf32, #tpu.memory_space<vmem>>, vector<8x16xf32>
    tpu.vector_store %arg8[%c0_18, %c0_19], %35 {strides = array<i32>} : memref<8x16xf32, #tpu.memory_space<vmem>>, vector<8x16xf32>,
    return
  }
  func.func @transform_0(%arg0: i32) -> (i32, i32) {
    %c0_i32 = arith.constant 0 : i32
    %c0_i32_0 = arith.constant 0 : i32
    return %arg0, %c0_i32 : i32, i32
  }
  func.func @transform_1(%arg0: i32) -> (i32, i32, i32) {
    %c0_i32 = arith.constant 0 : i32
    %c0_i32_0 = arith.constant 0 : i32
    %c0_i32_1 = arith.constant 0 : i32
    return %arg0, %c0_i32, %c0_i32_0 : i32, i32, i32
  }
  func.func @transform_2(%arg0: i32) -> (i32, i32) {
    %c0_i32 = arith.constant 0 : i32
    %c0_i32_0 = arith.constant 0 : i32
    %c0_i32_1 = arith.constant 0 : i32
    return %c0_i32, %c0_i32_0 : i32, i32
  }
  func.func @transform_3(%arg0: i32) -> (i32, i32) {
    %c0_i32 = arith.constant 0 : i32
    %c0_i32_0 = arith.constant 0 : i32
    %c0_i32_1 = arith.constant 0 : i32
    return %c0_i32, %c0_i32_0 : i32, i32
  }
  func.func @transform_4(%arg0: i32) -> (i32, i32) {
    %c0_i32 = arith.constant 0 : i32
    %c0_i32_0 = arith.constant 0 : i32
    %c0_i32_1 = arith.constant 0 : i32
    return %c0_i32, %c0_i32_0 : i32, i32
  }
  func.func @transform_5(%arg0: i32) -> (i32, i32) {
    %c0_i32 = arith.constant 0 : i32
    %c0_i32_0 = arith.constant 0 : i32
    %c0_i32_1 = arith.constant 0 : i32
    return %c0_i32, %c0_i32_0 : i32, i32
  }
  func.func @transform_6(%arg0: i32) -> (i32, i32) {
    %c0_i32 = arith.constant 0 : i32
    %c0_i32_0 = arith.constant 0 : i32
    %c0_i32_1 = arith.constant 0 : i32
    return %c0_i32, %c0_i32_0 : i32, i32
  }
  func.func @transform_7(%arg0: i32) -> (i32, i32) {
    %c0_i32 = arith.constant 0 : i32
    %c0_i32_0 = arith.constant 0 : i32
    return %arg0, %c0_i32 : i32, i32
  }
}

</mosaic_0001>

<bundles_post_ra>
// kernel: tpu_custom_call.1
= control target key start
LH: loop header
LB: loop body
LE: loop exit
PB: predicated region body
PF: predicated region fallthrough
CT: control target
= control target key end

     0   :  { %s2690_s0 = inlined_call_operand.hbm [shape: f32[16,128], index: 0, kind: input, shape index: {}]   ;;  %s2691_s1 = inlined_call_operand.hbm [shape: f32[16,16,128], index: 1, kind: input, shape index: {}]   ;;  %s2692_s2 = inlined_call_operand.hbm [shape: f32[128,128], index: 2, kind: input, shape index: {}]   ;;  %s2693_s3 = inlined_call_operand.hbm [shape: f32[128,128], index: 3, kind: input, shape index: {}]   ;;  %s2694_s4 = inlined_call_operand.vmem [shape: f32[1,128], index: 4, kind: input, shape index: {}]   ;;  %s2695_s5 = inlined_call_operand.vmem [shape: f32[1,128], index: 5, kind: input, shape index: {}]   ;;  %s2696_s6 = inlined_call_operand.<no memory space> [shape: f32[1,1], index: 6, kind: input, shape index: {}]   ;;  %s2697_s7 = inlined_call_operand.hbm [shape: f32[16,16], index: 7, kind: output, shape index: {}]  }
   0x1   :  { %2703 = sst [smem:[#allocation17_spill]] %s2690_s0  ;;  %v12_v0 = vstv %s2696_s6 }
   0x2   :  { %2704 = sst [smem:[#allocation18_spill]] %s2692_s2  ;;  %13 = vst [vmem:[#allocation2] sm:$0x1] %v12_v0 }
   0x3   :  { %14 = vsyncpa [#allocation4], 0 }
   0x4   :  { %16 = vsyncpa [#allocation4 + $0x1], 0 }
   0x5   :  { %17 = vsyncpa [#allocation7], 0 }
   0x6   :  { %19 = vsyncpa [#allocation7 + $0x1], 0 }
   0x7   :  { %20 = vsyncpa [#allocation10], 0 }
   0x8   :  { %21 = vsyncpa [#allocation5], 0 }
   0x9   :  { %23 = vsyncpa [#allocation5 + $0x1], 0  ;;  %s2085_s26 = smov 0   ;;  %s2087_s27 = smov 0  }
   0xa   :  { %s2089_s28 = smov 0   ;;  %s2091_s29 = smov 0  }
   0xb LB: > { %s2106_s6 = sadd.s32 4294967295, %s2029_s29   ;;  %s1533_s30 = sadd.s32 4294967294, %s2029_s29   ;;  %s2029_s29 = sphi %s2091_s29, %s2728_s29   ;;  %s2025_s28 = sphi %s2089_s28, %s2727_s28   ;;  %s2021_s27 = sphi %s2087_s27, %s2726_s27   ;;  %s2017_s26 = sphi %s2085_s26, %s2725_s26  }
   0xc   : > { %p49_p0 = scmp.ne.s32.totalorder %s2021_s27, %s2017_s26  ;;  %p2700_p1 = scmp.eq.s32.totalorder %s2106_s6, 0 }
   0xd   : > { %p204_p2 = scmp.eq.s32.totalorder %s2106_s6, 1  ;;  %p210_p3 = scmp.eq.s32.totalorder %s1533_s30, 1 }
   0xe   : > { %p2115_p4 = por %p2700_p1, %p49_p0  ;;  %p1534_p5 = scmp.ge.s32.totalorder %s2029_s29, 1 }
   0xf   : > { %p2120_p6 = por %p210_p3, %p49_p0  ;;  %p217_p7 = scmp.lt.s32.totalorder %s2029_s29, 3 }
  0x10   : > { %s2705_s8 = scalar_select %p2115_p4, 1, 0 }
  0x11   : > { %s2706_s9 = scalar_select %p2120_p6, 1, 0 }
  0x12   : > { %p2125_p8 = pnand %p1534_p5, %p217_p7  ;;  %s2031_s11 = smov [#allocation8]  }
  0x13   : > { %s229_s12 = sshll.u32 %s2031_s11, 4  ;;  %s2032_s14 = smov [#allocation9]   ;;  %s230_s12 = int_to_ptr.vmem [resolvable:$true] %s229_s12 }
  0x14   : > { %p1713_p9 = pneg %p2125_p8  ;;  %s242_s15 = sshll.u32 %s2032_s14, 4  ;;  %s243_s15 = int_to_ptr.vmem [resolvable:$true] %s242_s15 }
  0x15   : > { %s1856_s16 = scalar_lea.vmem %s230_s12, 2048  ;;  %p1864_p5 = scmp.lt.s32.totalorder %s230_s12, %s230_s12 }
  0x16   : > { %p2134_p11 = pnand %p1713_p9, %p2700_p1  ;;  %p1857_p13 = scmp.ne.s32.totalorder %s230_s12, %s1856_s16 }
  0x17   : > { %p1865_p7 = scmp.lt.s32.totalorder %s1856_s16, %s1856_s16 }
  0x18   : > { %p1847_p12 = pneg %p2134_p11 }
  0x19   : > { %p1866_p10 = por %p1865_p7, %p1864_p5 }
  0x1a   : > { %p1859_p0 = pnand %p1857_p13, %p1847_p12 }
  0x1c   : > { %p1860_p3 = pneg %p1859_p0 }
  0x1e   : > { %p1867_p9 = pnand %p1866_p10, %p1860_p3 }
  0x20   : > { %1870 = shalt.err (!%p1867_p9)
}
  0x21   : > { %s2698_s17 = smov 128   ;;  %s2699_s18 = smov 8  }
  0x22   : > { %s2709_s2 = sld [smem:[#allocation18_spill]]  ;;  %s1882_s21 = scalar_lea.vmem %s243_s15, 2048 }
  0x23   : > { %p1883_p13 = scmp.ne.s32.totalorder %s243_s15, %s1882_s21  ;;  %p1890_p10 = scmp.lt.s32.totalorder %s243_s15, %s243_s15 }
  0x24   : > { %p1891_p3 = scmp.lt.s32.totalorder %s1882_s21, %s1882_s21 }
  0x25   : > { %p1885_p0 = pnand %p1883_p13, %p1847_p12 }
  0x26   : > { %p1892_p7 = por %p1891_p3, %p1890_p10 }
  0x27   : > { %p1886_p5 = pneg %p1885_p0 }
  0x28   : > { %1716 = dma.hbm_to_vmem [thread:$0]  (!%p2134_p11), %s2709_s2, 2048, %s230_s12, [#allocation7], %s2698_s17, %s2698_s17, %s2699_s18  }
  0x29   : > { %p1893_p9 = pnand %p1892_p7, %p1886_p5 }
  0x2b   : > { %1896 = shalt.err (!%p1893_p9)
}
  0x2c   : > { %1719 = dma.hbm_to_vmem [thread:$0]  (!%p2134_p11), %s2693_s3, 2048, %s243_s15, [#allocation10], %s2698_s17, %s2698_s17, %s2699_s18  }
  0x2d   : > { %s2163_s24 = sadd.s32 1, %s2029_s29   ;;  %s36_s25 = sadd.s32 1, %s2025_s28 }
  0x2e   : > { %s33_s30 = ssub.s32 %s2029_s29, %s2163_s24  ;;  %p43_p12 = scmp.ne.s32.totalorder %s2025_s28, %s2021_s27 }
  0x2f   : > { %p34_p13 = scmp.eq.s32.totalorder %s33_s30, 0  ;;  %p44_p0 = scmp.eq.s32.totalorder %s2029_s29, 0 }
  0x30   : > { %p2173_p5 = por %p204_p2, %p43_p12  ;;  %p1733_p10 = scmp.lt.s32.totalorder %s2029_s29, 2 }
  0x31   : > { %s2179_s12 = scalar_select %p34_p13, %s2025_s28, %s36_s25  }
  0x32   : > { %s2710_s11 = scalar_select %p2173_p5, 1, 0 }
  0x33   : > { %p45_p3 = por %p44_p0, %p43_p12  ;;  %s2182_s13 = sand.u32 1, %s2025_s28  }
  0x34   : > { %s1538_s14 = sshll.u32 %s2182_s13, 3  ;;  %s1539_s15 = sshll.u32 %s2029_s29, 7 }
  0x35   : > { %s2711_s0 = sld [smem:[#allocation17_spill]]  ;;  %s269_s21 = scalar_lea.vmem [#allocation3], %s1538_s14 }
  0x36   : > { %s276_s22 = sshll.u32 %s269_s21, 4  ;;  %p2193_p2 = pnand %p1733_p10, %p45_p3  ;;  %s2191_s22 = int_to_ptr.vmem [resolvable:$true] %s276_s22 }
  0x37   : > { %s266_s17 = scalar_lea.sflag [#allocation4], %s2182_s13 }
  0x38   : > { %p1899_p7 = pneg %p2193_p2 }
  0x3b   : > { %s2189_s20 = scalar_lea.hbm %s2711_s0, %s1539_s15  ;;  %s1902_s16 = scalar_lea.hbm %s2711_s0, 256 }
  0x3c   : > { %s1897_s18 = scalar_lea.hbm %s2189_s20, 128  ;;  %p1903_p13 = scmp.lt.s32.totalorder %s2189_s20, %s2711_s0 }
  0x3d   : > { %p1898_p11 = scmp.ne.s32.totalorder %s2189_s20, %s1897_s18  ;;  %p1904_p0 = scmp.lt.s32.totalorder %s1902_s16, %s1897_s18 }
  0x3f   : > { %p1900_p9 = pnand %p1899_p7, %p1898_p11  ;;  %p1905_p10 = por %p1904_p0, %p1903_p13 }
  0x41   : > { %p1901_p12 = pneg %p1900_p9 }
  0x43   : > { %p1906_p3 = pnand %p1905_p10, %p1901_p12 }
  0x45   : > { %1909 = shalt.err (!%p1906_p3)
}
  0x46   : > { %s1910_s30 = scalar_lea.vmem %s2191_s22, 128  ;;  %s2035_s14 = smov [#allocation3]  }
  0x47   : > { %p1911_p1 = scmp.ne.s32.totalorder %s2191_s22, %s1910_s30  ;;  %s1915_s15 = sshll.u32 %s2035_s14, 4  ;;  %s1916_s15 = int_to_ptr.vmem [resolvable:$false] %s1915_s15 }
  0x48   : > { %s1917_s25 = scalar_lea.vmem %s1916_s15, 256  ;;  %p1918_p6 = scmp.lt.s32.totalorder %s2191_s22, %s1916_s15 }
  0x49   : > { %p1913_p11 = pnand %p1911_p1, %p1899_p7  ;;  %p1919_p5 = scmp.lt.s32.totalorder %s1917_s25, %s1910_s30 }
  0x4b   : > { %p1914_p9 = pneg %p1913_p11  ;;  %p1920_p4 = por %p1919_p5, %p1918_p6 }
  0x4d   : > { %p1921_p13 = pnand %p1920_p4, %p1914_p9 }
  0x4f   : > { %1924 = shalt.err (!%p1921_p13)
}
  0x50   : > { %1723 = dma.hbm_to_vmem [thread:$0]  (!%p2193_p2), %s2189_s20, 128, %s2191_s22, %s266_s17  }
  0x51   : > { %s2713_s18 = sshll.u32 %s2182_s13, 7  ;;  %s1558_s21 = sshll.u32 %s2029_s29, 11 }
  0x52   : > { %s287_s16 = scalar_lea.vmem [#allocation6], %s2713_s18  ;;  %s2232_s30 = scalar_lea.hbm %s2691_s1, %s1558_s21 }
  0x53   : > { %s295_s19 = sshll.u32 %s287_s16, 4  ;;  %s2714_s15 = sand.u32 1, %s2029_s29   ;;  %s2226_s19 = int_to_ptr.vmem [resolvable:$true] %s295_s19 }
  0x54   : > { %s284_s0 = scalar_lea.sflag [#allocation7], %s2714_s15  ;;  %s1925_s2 = scalar_lea.hbm %s2232_s30, 2048 }
  0x55   : > { %p1926_p1 = scmp.ne.s32.totalorder %s2232_s30, %s1925_s2  ;;  %s1930_s20 = scalar_lea.hbm %s2691_s1, 4096 }
  0x56   : > { %p1931_p5 = scmp.lt.s32.totalorder %s2232_s30, %s2691_s1  ;;  %p1932_p12 = scmp.lt.s32.totalorder %s1930_s20, %s1925_s2 }
  0x57   : > { %p1928_p4 = pnand %p1926_p1, %p1899_p7 }
  0x58   : > { %p1933_p0 = por %p1932_p12, %p1931_p5 }
  0x59   : > { %p1929_p6 = pneg %p1928_p4 }
  0x5b   : > { %p1934_p10 = pnand %p1933_p0, %p1929_p6 }
  0x5d   : > { %1937 = shalt.err (!%p1934_p10)
}
  0x5e   : > { %s1938_s16 = scalar_lea.vmem %s2226_s19, 2048  ;;  %s2036_s21 = smov [#allocation6]  }
  0x5f   : > { %p1939_p3 = scmp.ne.s32.totalorder %s2226_s19, %s1938_s16  ;;  %s1943_s14 = sshll.u32 %s2036_s21, 4  ;;  %s1944_s14 = int_to_ptr.vmem [resolvable:$false] %s1943_s14 }
  0x60   : > { %s1945_s25 = scalar_lea.vmem %s1944_s14, 4096  ;;  %p1946_p13 = scmp.lt.s32.totalorder %s2226_s19, %s1944_s14 }
  0x61   : > { %p1941_p11 = pnand %p1939_p3, %p1899_p7  ;;  %p1947_p1 = scmp.lt.s32.totalorder %s1945_s25, %s1938_s16 }
  0x63   : > { %p1942_p9 = pneg %p1941_p11  ;;  %p1948_p4 = por %p1947_p1, %p1946_p13 }
  0x65   : > { %p1949_p5 = pnand %p1948_p4, %p1942_p9 }
  0x67   : > { %1952 = shalt.err (!%p1949_p5)
}
  0x68   : > { %s2715_s2 = smov 8   ;;  %s2716_s15 = smov 128  }
  0x69   : > { %1726 = dma.hbm_to_vmem [thread:$0]  (!%p2193_p2), %s2232_s30, 2048, %s2226_s19, %s284_s0, %s2716_s15, %s2716_s15, %s2715_s2  }
  0x6a   : > { %307 = sbr.rel (%p2125_p8) target bundleno = 1240 (0x4d8), region = 48  ;;  %s2264_s17 = sand.u32 (!%p2125_p8), 1, %s2021_s27  }
  0x6b   : > { %s1545_s13 = sshll.u32 (!%p2125_p8), %s2264_s17, 3  ;;  %s310_s20 = scalar_lea.sflag (!%p2125_p8), [#allocation4], %s2264_s17 }
  0x6c   : > { %s2270_s23 = scalar_lea.vmem (!%p2125_p8), [#allocation3], %s1545_s13  ;;  %p2717_p7 = scmp.ne.s32.totalorder (!%p2125_p8), %s2705_s8, 0 }
  0x6f   : > { %1996 = dma.done.wait (%p2717_p7), %s310_s20, 128  }
  0x70   : > { %1998 = vsyncadd (%p2717_p7), %s310_s20, 4294967168  ;;  %s318_s0 = sand.u32 1, %s2106_s6   ;;  %s1546_s10 = sshll.u32 %s2264_s17, 7 }
  0x71   : > { %s319_s19 = scalar_lea.sflag [#allocation7], %s318_s0  ;;  %s2278_s30 = scalar_lea.vmem [#allocation6], %s1546_s10 }
  0x72   : > { %2000 = dma.done.wait (%p2717_p7), %s319_s19, 2048  }
  0x73   : > { %2002 = vsyncadd (%p2717_p7), %s319_s19, 4294965248  ;;  %p2718_p8 = scmp.eq.s32.totalorder %s2106_s6, 0 }
  0x75   : > { %2004 = dma.done.wait (%p2718_p8), [#allocation7], 2048   ;;  %p2719_p2 = pmov %p2718_p8 }
  0x77   : > { %2006 = vsyncadd (%p2719_p2), [#allocation7], 4294965248  ;;  %p2720_p6 = pmov %p2719_p2 }
  0x78   : > { %p2721_p12 = pmov %p2719_p2 }
  0x79   : > { %2008 = dma.done.wait (%p2720_p6), [#allocation10], 2048  }
  0x7a   : > { %2010 = vsyncadd (%p2721_p12), [#allocation10], 4294965248  ;;  %v2037_v1 = vmov 0.0   ;;  %vm2038_vm0 = vmmov 0   ;;  %v383_v2 = vld [vmem:[#allocation8 + $0x78] sm:$0xff]  ;;  %v382_v4 = vld [vmem:[#allocation8 + $0x70] sm:$0xff]  ;;  %v636_v54 = vlaneseq }
  0x7b   : > { %1608 = vmatprep.subr.mxu0 %v2037_v1  ;;  %1640 = vmatprep.mubr.msk.f32.mxu0 %vm2038_vm0, %v2037_v1  ;;  %v485_v3 = vld [vmem:[#allocation9 + $0x78] sm:$0xff]  ;;  %v484_v5 = vld [vmem:[#allocation9 + $0x70] sm:$0xff]  ;;  %v381_v6 = vld [vmem:[#allocation8 + $0x68] sm:$0xff]  ;;  %v2039_v51 = vmov 0   ;;  %v2040_v52 = vmov 1966171168  }
  0x7c   : > { %1609 = vmatpush3.msra.mxu0 %v383_v2  ;;  %1643 = vmatprep.subr.mxu1 %v485_v3  ;;  %v483_v7 = vld [vmem:[#allocation9 + $0x68] sm:$0xff]  ;;  %v380_v8 = vld [vmem:[#allocation8 + $0x60] sm:$0xff]  ;;  %v379_v10 = vld [vmem:[#allocation8 + $0x58] sm:$0xff]  ;;  %v634_v53 = vunpack.c.l.s4 %v2040_v52  ;;  %v2327_v56 = vshrl.u32 %v636_v54, 7  ;;  %vm884_vm1 = vcmask 130112   ;;  %vm949_vm2 = vcmask 1041409  }
  0x7d   : > { %1610 = vmatprep.subr.mxu0 %v2037_v1  ;;  %1644 = vmatpush3.msra.mxu1 %v485_v3  ;;  %v482_v9 = vld [vmem:[#allocation9 + $0x60] sm:$0xff]  ;;  %v481_v11 = vld [vmem:[#allocation9 + $0x58] sm:$0xff]  ;;  %v378_v12 = vld [vmem:[#allocation8 + $0x50] sm:$0xff]  ;;  %vm951_vm3 = vcmask 1042434   ;;  %vm953_vm4 = vcmask 1043459   ;;  %vm955_vm5 = vcmask 1044484  }
  0x7e   : > { %1611 = vmatpush3.msra.mxu0 %v382_v4  ;;  %1645 = vmatprep.subr.mxu1 %v484_v5  ;;  %v480_v13 = vld [vmem:[#allocation9 + $0x50] sm:$0xff]  ;;  %v377_v14 = vld [vmem:[#allocation8 + $0x48] sm:$0xff]  ;;  %v376_v16 = vld [vmem:[#allocation8 + $0x40] sm:$0xff]  ;;  %v635_v55 = vunpack.c.0.s8 %v634_v53  ;;  %v2331_v60 = vsub.s32 0, %v2327_v56  ;;  %vm957_vm6 = vcmask 1045509   ;;  %vm959_vm7 = vcmask 1046534  }
  0x7f   : > { %1612 = vmatprep.subr.mxu0 %v2037_v1  ;;  %1646 = vmatpush3.msra.mxu1 %v484_v5  ;;  %v479_v15 = vld [vmem:[#allocation9 + $0x48] sm:$0xff]  ;;  %v478_v17 = vld [vmem:[#allocation9 + $0x40] sm:$0xff]  ;;  %v375_v18 = vld [vmem:[#allocation8 + $0x38] sm:$0xff]  ;;  %vm961_vm8 = vcmask 1047559   ;;  %vm964_vm9 = vcmask 130048   ;;  %s1554_s21 = sshll.u32 %s2106_s6, 7 }
  0x80   : > { %1613 = vmatpush3.msra.mxu0 %v381_v6  ;;  %1647 = vmatprep.subr.mxu1 %v483_v7  ;;  %v477_v19 = vld [vmem:[#allocation9 + $0x38] sm:$0xff]  ;;  %v374_v20 = vld [vmem:[#allocation8 + $0x30] sm:$0xff]  ;;  %v373_v22 = vld [vmem:[#allocation8 + $0x28] sm:$0xff]  ;;  %v638_v57 = vsub.s32 %v635_v55, %v2327_v56  ;;  %s365_s14 = scalar_lea.vmem [#allocation11], %s1545_s13  ;;  %s2651_s6 = scalar_lea.hbm %s2697_s7, %s1554_s21 }
  0x81   : > { %1614 = vmatprep.subr.mxu0 %v2037_v1  ;;  %1648 = vmatpush3.msra.mxu1 %v483_v7  ;;  %v476_v21 = vld [vmem:[#allocation9 + $0x30] sm:$0xff]  ;;  %v475_v23 = vld [vmem:[#allocation9 + $0x28] sm:$0xff]  ;;  %v372_v24 = vld [vmem:[#allocation8 + $0x20] sm:$0xff]  ;;  %s1421_s25 = sshll.u32 %s365_s14, 4  ;;  %s1408_s13 = scalar_lea.sflag [#allocation5], %s2264_s17  ;;  %s1422_s25 = int_to_ptr.vmem [resolvable:$true] %s1421_s25 }
  0x82   : > { %1615 = vmatpush3.msra.mxu0 %v380_v8  ;;  %1649 = vmatprep.subr.mxu1 %v482_v9  ;;  %v474_v25 = vld [vmem:[#allocation9 + $0x20] sm:$0xff]  ;;  %v371_v26 = vld [vmem:[#allocation8 + $0x18] sm:$0xff]  ;;  %v370_v28 = vld [vmem:[#allocation8 + $0x10] sm:$0xff]  ;;  %s1953_s20 = scalar_lea.vmem %s1422_s25, 128  ;;  %p2722_p10 = scmp.ne.s32.totalorder %s2710_s11, 0 }
  0x83   : > { %1616 = vmatprep.subr.mxu0 %v2037_v1  ;;  %1650 = vmatpush3.msra.mxu1 %v482_v9  ;;  %v473_v27 = vld [vmem:[#allocation9 + $0x18] sm:$0xff]  ;;  %v472_v29 = vld [vmem:[#allocation9 + $0x10] sm:$0xff]  ;;  %v369_v30 = vld [vmem:[#allocation8 + $0x8] sm:$0xff]  ;;  %p1954_p0 = scmp.ne.s32.totalorder %s1422_s25, %s1953_s20 }
  0x84   : > { %1617 = vmatpush3.msra.mxu0 %v379_v10  ;;  %1651 = vmatprep.subr.mxu1 %v481_v11  ;;  %v471_v31 = vld [vmem:[#allocation9 + $0x8] sm:$0xff]  ;;  %v368_v32 = vld [vmem:[#allocation8] sm:$0xff]  ;;  %v367_v34 = vld [vmem:[%s2270_s23] sm:$0xff]  ;;  %s2041_s23 = smov [#allocation11]  }
  0x85   : > { %1618 = vmatprep.subr.mxu0 %v2037_v1  ;;  %1652 = vmatpush3.msra.mxu1 %v481_v11  ;;  %v470_v33 = vld [vmem:[#allocation9] sm:$0xff]  ;;  %v455_v36 = vld [vmem:[%s2278_s30 + $0x8] sm:$0xff]  ;;  %v456_v37 = vld [vmem:[%s2278_s30 + $0x10] sm:$0xff]  ;;  %p1955_p3 = pnand %p1954_p0, %p2722_p10  ;;  %s1957_s0 = sshll.u32 %s2041_s23, 4  ;;  %s1958_s0 = int_to_ptr.vmem [resolvable:$false] %s1957_s0 }
  0x86   : > { %1619 = vmatpush3.msra.mxu0 %v378_v12  ;;  %1653 = vmatprep.subr.mxu1 %v480_v13  ;;  %v454_v35 = vld [vmem:[%s2278_s30] sm:$0xff]  ;;  %v457_v38 = vld [vmem:[%s2278_s30 + $0x18] sm:$0xff]  ;;  %v459_v40 = vld [vmem:[%s2278_s30 + $0x28] sm:$0xff]  ;;  %s1959_s10 = scalar_lea.vmem %s1958_s0, 256  ;;  %p1960_p9 = scmp.lt.s32.totalorder %s1422_s25, %s1958_s0 }
  0x87   : > { %1620 = vmatprep.subr.mxu0 %v2037_v1  ;;  %1654 = vmatpush3.msra.mxu1 %v480_v13  ;;  %v458_v39 = vld [vmem:[%s2278_s30 + $0x20] sm:$0xff]  ;;  %v460_v41 = vld [vmem:[%s2278_s30 + $0x30] sm:$0xff]  ;;  %v461_v42 = vld [vmem:[%s2278_s30 + $0x38] sm:$0xff]  ;;  %p1956_p11 = pneg %p1955_p3  ;;  %p1961_p13 = scmp.lt.s32.totalorder %s1959_s10, %s1953_s20 }
  0x88   : > { %1621 = vmatpush3.msra.mxu0 %v377_v14  ;;  %1655 = vmatprep.subr.mxu1 %v479_v15  ;;  %v462_v43 = vld [vmem:[%s2278_s30 + $0x40] sm:$0xff]  ;;  %v463_v44 = vld [vmem:[%s2278_s30 + $0x48] sm:$0xff]  ;;  %v464_v45 = vld [vmem:[%s2278_s30 + $0x50] sm:$0xff] }
  0x89   : > { %1622 = vmatprep.subr.mxu0 %v2037_v1  ;;  %1656 = vmatpush3.msra.mxu1 %v479_v15  ;;  %v465_v46 = vld [vmem:[%s2278_s30 + $0x58] sm:$0xff]  ;;  %v466_v47 = vld [vmem:[%s2278_s30 + $0x60] sm:$0xff]  ;;  %v467_v48 = vld [vmem:[%s2278_s30 + $0x68] sm:$0xff]  ;;  %p1962_p1 = por %p1961_p13, %p1960_p9 }
  0x8a   : > { %1623 = vmatpush3.msra.mxu0 %v376_v16  ;;  %1657 = vmatprep.subr.mxu1 %v478_v17  ;;  %v468_v49 = vld [vmem:[%s2278_s30 + $0x70] sm:$0xff]  ;;  %v469_v50 = vld [vmem:[%s2278_s30 + $0x78] sm:$0xff]  ;;  %v2337_v6 = vld [vmem:[%s2694_s4] ss:$0 sm:$0xff] }
  0x8b   : > { %1624 = vmatprep.subr.mxu0 %v2037_v1  ;;  %1658 = vmatpush3.msra.mxu1 %v478_v17  ;;  %p1963_p4 = pnand %p1962_p1, %p1956_p11 }
  0x8c   : > { %1625 = vmatpush3.msra.mxu0 %v375_v18  ;;  %1659 = vmatprep.subr.mxu1 %v477_v19 }
  0x8d   : > { %1626 = vmatprep.subr.mxu0 %v2037_v1  ;;  %1660 = vmatpush3.msra.mxu1 %v477_v19 }
  0x8e   : > { %1627 = vmatpush3.msra.mxu0 %v374_v20  ;;  %1661 = vmatprep.subr.mxu1 %v476_v21 }
  0x8f   : > { %1628 = vmatprep.subr.mxu0 %v2037_v1  ;;  %1662 = vmatpush3.msra.mxu1 %v476_v21 }
  0x90   : > { %1629 = vmatpush3.msra.mxu0 %v373_v22  ;;  %1663 = vmatprep.subr.mxu1 %v475_v23 }
  0x91   : > { %1630 = vmatprep.subr.mxu0 %v2037_v1  ;;  %1664 = vmatpush3.msra.mxu1 %v475_v23 }
  0x92   : > { %1631 = vmatpush3.msra.mxu0 %v372_v24  ;;  %1665 = vmatprep.subr.mxu1 %v474_v25 }
  0x93   : > { %1632 = vmatprep.subr.mxu0 %v2037_v1  ;;  %1666 = vmatpush3.msra.mxu1 %v474_v25 }
  0x94   : > { %1633 = vmatpush3.msra.mxu0 %v371_v26  ;;  %1667 = vmatprep.subr.mxu1 %v473_v27 }
  0x95   : > { %1634 = vmatprep.subr.mxu0 %v2037_v1  ;;  %1668 = vmatpush3.msra.mxu1 %v473_v27 }
  0x96   : > { %1635 = vmatpush3.msra.mxu0 %v370_v28  ;;  %1669 = vmatprep.subr.mxu1 %v472_v29 }
  0x97   : > { %1636 = vmatprep.subr.mxu0 %v2037_v1  ;;  %1670 = vmatpush3.msra.mxu1 %v472_v29 }
  0x98   : > { %1637 = vmatpush3.msra.mxu0 %v369_v30  ;;  %1671 = vmatprep.subr.mxu1 %v471_v31 }
  0x99   : > { %1638 = vmatprep.subr.mxu0 %v2037_v1  ;;  %1672 = vmatpush3.msra.mxu1 %v471_v31 }
  0x9a   : > { %1639 = vmatpush3.msra.mxu0 %v368_v32  ;;  %1673 = vmatprep.subr.mxu1 %v470_v33 }
  0x9b   : > { %1641 = vmatmul.mubr.f32.vlgmr.msra.gmra.mxu0 %v367_v34  ;;  %1674 = vmatpush3.msra.mxu1 %v470_v33 }
  0x9c   : > { %1675 = vmatprep.mubr.f32.mxu1 %v454_v35  ;;  %1777 = vset.pattern.permute.xlu0 %v2039_v51 }
  0x9d   : > { %1676 = vmatmul.mubr.f32.vlgmr.msra.gmra.mxu1 %v455_v36  ;;  %1778 = vset.pattern.permute.xlu1 %v2039_v51 }
  0x9e   : > { %1678 = vmatprep.mubr.f32.mxu1 %v456_v37 }
  0xa1   : > { %1679 = vmatmul.mubr.f32.gmra.mxu1 %v457_v38 }
  0xa2   : > { %1681 = vmatprep.mubr.f32.mxu1 %v458_v39 }
  0xa5   : > { %1682 = vmatmul.mubr.f32.gmra.mxu1 %v459_v40 }
  0xa6   : > { %1684 = vmatprep.mubr.f32.mxu1 %v460_v41 }
  0xa9   : > { %1685 = vmatmul.mubr.f32.gmra.mxu1 %v461_v42 }
  0xaa   : > { %1687 = vmatprep.mubr.f32.mxu1 %v462_v43 }
  0xad   : > { %1688 = vmatmul.mubr.f32.gmra.mxu1 %v463_v44 }
  0xae   : > { %1690 = vmatprep.mubr.f32.mxu1 %v464_v45 }
  0xb1   : > { %1691 = vmatmul.mubr.f32.gmra.mxu1 %v465_v46  ;;  %v2356_v46 = vld [vmem:[%s2695_s5] ss:$0 sm:$0xff] }
  0xb2   : > { %1693 = vmatprep.mubr.f32.mxu1 %v466_v47 }
  0xb5   : > { %1694 = vmatmul.mubr.f32.gmra.mxu1 %v467_v48 }
  0xb6   : > { %1696 = vmatprep.mubr.f32.mxu1 %v468_v49 }
  0xb9   : > { %1697 = vmatmul.mubr.f32.gmra.mxu1 %v469_v50 }
 0x15b   : > { %v450_v58 = vpop.f32.mrf.mxu0 }
 0x15c   : > { %v639_v59 = vrot.slane %v450_v58, %v638_v57  ;;  %v632_v5 = vcombine.high %v450_v58, %v450_v58 }
 0x15d   : > { %v1677_v61 = vpop.f32.mrf.mxu1  ;;  %v1642_v62 = vpop.f32.mrf.mxu0 }
 0x15e   : > { %v647_v63 = vcombine.high %v639_v59, %v639_v59  ;;  %v655_v0 = vrot.slane %v639_v59, %v638_v57  ;;  %v646_v17 = vrot.slane %v632_v5, %v638_v57 }
 0x15f   : > { %v552_v1 = vpop.f32.mrf.mxu1 }
 0x160   : > { %v684_v2 = vrot.slane %v655_v0, %v2331_v60  ;;  %v669_v3 = vrot.slane %v647_v63, %v638_v57  ;;  %v677_v4 = vcombine.high %v655_v0, %v655_v0  ;;  %v648_v25 = vcombine.high %v646_v17, %v646_v17 }
 0x161   : > { %v1680_v7 = vpop.f32.mrf.mxu1  ;;  %v662_v28 = vrot.slane %v646_v17, %v638_v57 }
 0x162   : > { %v722_v8 = vadd.f32 %v1677_v61, %v684_v2  ;;  %v721_v9 = vadd.f32 %v684_v2, %v552_v1  ;;  %v688_v10 = vrot.slane %v669_v3, %v2331_v60  ;;  %v692_v12 = vrot.slane %v677_v4, %v2331_v60 }
 0x163   : > { %v562_v11 = vpop.f32.mrf.mxu1  ;;  %v679_v19 = vcombine.high %v669_v3, %v669_v3  ;;  %v700_v35 = vrot.slane %v662_v28, %v2331_v60  ;;  %v676_v36 = vrot.slane %v648_v25, %v638_v57  ;;  %v678_v44 = vcombine.high %v662_v28, %v662_v28 }
 0x164   : > { %v745_v13 = vadd.f32 %v2337_v6, %v722_v8  ;;  %v744_v14 = vadd.f32 %v2337_v6, %v721_v9  ;;  %v724_v15 = vadd.f32 %v1680_v7, %v688_v10  ;;  %v723_v16 = vadd.f32 %v688_v10, %v562_v11 }
 0x165   : > { %v1683_v18 = vpop.f32.mrf.mxu1  ;;  %v696_v27 = vrot.slane %v679_v19, %v2331_v60  ;;  %v704_v43 = vrot.slane %v676_v36, %v2331_v60  ;;  %v708_v55 = vrot.slane %v678_v44, %v2331_v60  ;;  %v680_v58 = vcombine.high %v676_v36, %v676_v36 }
 0x166   : > { %v746_v20 = vadd.f32 %v2337_v6, %v723_v16  ;;  %1779 = vtanh.f32 %v744_v14  ;;  %v747_v21 = vadd.f32 %v2337_v6, %v724_v15  ;;  %v726_v22 = vadd.f32 %v1683_v18, %v692_v12 }
 0x167   : > { %v572_v23 = vpop.f32.mrf.mxu1  ;;  %1781 = vtanh.f32 %v745_v13  ;;  %v712_v5 = vrot.slane %v680_v58, %v2331_v60 }
 0x168   : > { %v725_v24 = vadd.f32 %v692_v12, %v572_v23  ;;  %1783 = vtanh.f32 %v746_v20  ;;  %v749_v30 = vadd.f32 %v2337_v6, %v726_v22 }
 0x169   : > { %v1686_v26 = vpop.f32.mrf.mxu1  ;;  %1785 = vtanh.f32 %v747_v21 }
 0x16a   : > { %v748_v29 = vadd.f32 %v2337_v6, %v725_v24  ;;  %v728_v31 = vadd.f32 %v1686_v26, %v696_v27 }
 0x16b   : > { %v582_v32 = vpop.f32.mrf.mxu1 }
 0x16c   : > { %v727_v33 = vadd.f32 %v696_v27, %v582_v32  ;;  %1787 = vtanh.f32 %v748_v29  ;;  %v751_v38 = vadd.f32 %v2337_v6, %v728_v31 }
 0x16d   : > { %v1689_v34 = vpop.f32.mrf.mxu1  ;;  %1789 = vtanh.f32 %v749_v30 }
 0x16e   : > { %v750_v37 = vadd.f32 %v2337_v6, %v727_v33  ;;  %v730_v39 = vadd.f32 %v1689_v34, %v700_v35 }
 0x16f   : > { %v592_v40 = vpop.f32.mrf.mxu1 }
 0x170   : > { %v729_v41 = vadd.f32 %v700_v35, %v592_v40  ;;  %1791 = vtanh.f32 %v750_v37  ;;  %v753_v47 = vadd.f32 %v2337_v6, %v730_v39  ;;  %v1552_v39 = vld [vmem:[#allocation2] ss:$0 sm:$0xff] }
 0x171   : > { %v1692_v42 = vpop.f32.mrf.mxu1  ;;  %1793 = vtanh.f32 %v751_v38 }
 0x172   : > { %v752_v45 = vadd.f32 %v2337_v6, %v729_v41  ;;  %v732_v48 = vadd.f32 %v1692_v42, %v704_v43 }
 0x173   : > { %v602_v49 = vpop.f32.mrf.mxu1  ;;  %v1780_v50 = vpop.eup %1779 }
 0x174   : > { %v731_v51 = vadd.f32 %v704_v43, %v602_v49  ;;  %v1782_v52 = vpop.eup %1781  ;;  %1795 = vtanh.f32 %v752_v45  ;;  %v783_v57 = vmul.f32 %v1780_v50, %v2356_v46  ;;  %v755_v62 = vadd.f32 %v2337_v6, %v732_v48 }
 0x175   : > { %v1695_v53 = vpop.f32.mrf.mxu1  ;;  %v1784_v59 = vpop.eup %1783  ;;  %1797 = vtanh.f32 %v753_v47  ;;  %v784_v7 = vmul.f32 %v1782_v52, %v2356_v46 }
 0x176   : > { %v754_v61 = vadd.f32 %v2337_v6, %v731_v51  ;;  %v734_v63 = vadd.f32 %v1695_v53, %v708_v55  ;;  %799 = vadd.xlane.f32.xlu0 %v783_v57  ;;  %v785_v1 = vmul.f32 %v1784_v59, %v2356_v46  ;;  %v1786_v2 = vpop.eup %1785  ;;  %v874_v53 = vand.u32 127, %v636_v54 }
 0x177   : > { %v612_v0 = vpop.f32.mrf.mxu1  ;;  %v786_v13 = vmul.f32 %v1786_v2, %v2356_v46 }
 0x178   : > { %v733_v3 = vadd.f32 %v708_v55, %v612_v0  ;;  %1799 = vtanh.f32 %v754_v61  ;;  %803 = vadd.xlane.f32.xlu1 %v785_v1  ;;  %v757_v10 = vadd.f32 %v2337_v6, %v734_v63  ;;  %v879_v57 = vadd.s32 4294967288, %v874_v53 }
 0x179   : > { %v1698_v4 = vpop.f32.mrf.mxu1  ;;  %v1788_v8 = vpop.eup %1787  ;;  %1801 = vtanh.f32 %v755_v62  ;;  %v2385_v59 = vsub.s32 %v874_v53, %v2327_v56  ;;  %v987_v53 = vsub.s32 4, %v2327_v56 }
 0x17a   : > { %v756_v9 = vadd.f32 %v2337_v6, %v733_v3  ;;  %v736_v11 = vadd.f32 %v1698_v4, %v712_v5  ;;  %801 = vadd.xlane.f32.xlu0 %v784_v7  ;;  %v1790_v14 = vpop.eup %1789  ;;  %v787_v16 = vmul.f32 %v1788_v8, %v2356_v46  ;;  %v2388_v61 = vsub.s32 %v879_v57, %v2327_v56 }
 0x17b   : > { %v622_v12 = vpop.f32.mrf.mxu1  ;;  %v788_v20 = vmul.f32 %v1790_v14, %v2356_v46 }
 0x17c   : > { %v735_v15 = vadd.f32 %v712_v5, %v622_v12  ;;  %1803 = vtanh.f32 %v756_v9  ;;  %805 = vadd.xlane.f32.xlu1 %v786_v13  ;;  %v759_v19 = vadd.f32 %v2337_v6, %v736_v11 }
 0x17d   : > { %v1792_v17 = vpop.eup %1791  ;;  %1805 = vtanh.f32 %v757_v10 }
 0x17e   : > { %v758_v18 = vadd.f32 %v2337_v6, %v735_v15  ;;  %807 = vadd.xlane.f32.xlu0 %v787_v16  ;;  %v1794_v21 = vpop.eup %1793  ;;  %v789_v22 = vmul.f32 %v1792_v17, %v2356_v46 }
 0x17f   : > { %v790_v24 = vmul.f32 %v1794_v21, %v2356_v46 }
 0x180   : > { %1807 = vtanh.f32 %v758_v18  ;;  %809 = vadd.xlane.f32.xlu1 %v788_v20 }
 0x181   : > { %v1796_v23 = vpop.eup %1795  ;;  %1809 = vtanh.f32 %v759_v19 }
 0x182   : > { %811 = vadd.xlane.f32.xlu0 %v789_v22  ;;  %v1798_v25 = vpop.eup %1797  ;;  %v791_v26 = vmul.f32 %v1796_v23, %v2356_v46 }
 0x183   : > { %v792_v6 = vmul.f32 %v1798_v25, %v2356_v46 }
 0x184   : > { %813 = vadd.xlane.f32.xlu1 %v790_v24 }
 0x185   : > { %v1800_v27 = vpop.eup %1799 }
 0x186   : > { %815 = vadd.xlane.f32.xlu0 %v791_v26  ;;  %v1802_v28 = vpop.eup %1801  ;;  %v793_v29 = vmul.f32 %v1800_v27, %v2356_v46 }
 0x187   : > { %v794_v31 = vmul.f32 %v1802_v28, %v2356_v46 }
 0x188   : > { %817 = vadd.xlane.f32.xlu1 %v792_v6 }
 0x189   : > { %v1804_v30 = vpop.eup %1803 }
 0x18a   : > { %819 = vadd.xlane.f32.xlu0 %v793_v29  ;;  %v1806_v32 = vpop.eup %1805  ;;  %v795_v33 = vmul.f32 %v1804_v30, %v2356_v46 }
 0x18b   : > { %v796_v35 = vmul.f32 %v1806_v32, %v2356_v46 }
 0x18c   : > { %821 = vadd.xlane.f32.xlu1 %v794_v31 }
 0x18d   : > { %v1808_v34 = vpop.eup %1807 }
 0x18e   : > { %823 = vadd.xlane.f32.xlu0 %v795_v33  ;;  %v1810_v36 = vpop.eup %1809  ;;  %v797_v37 = vmul.f32 %v1808_v34, %v2356_v46 }
 0x18f   : > { %v798_v38 = vmul.f32 %v1810_v36, %v2356_v46 }
 0x190   : > { %825 = vadd.xlane.f32.xlu1 %v796_v35 }
 0x192   : > { %827 = vadd.xlane.f32.xlu0 %v797_v37 }
 0x194   : > { %829 = vadd.xlane.f32.xlu1 %v798_v38 }
 0x1a8   : > { %838 = vperm.xlu0 %1777, %v1552_v39  }
 0x1ff   : > { %v800_v40 = vpop.xlane.xlu0 %799 }
 0x201   : > { %v804_v41 = vpop.xlane.xlu1 %803 }
 0x203   : > { %v802_v42 = vpop.xlane.xlu0 %801 }
 0x205   : > { %v806_v43 = vpop.xlane.xlu1 %805 }
 0x207   : > { %v808_v44 = vpop.xlane.xlu0 %807 }
 0x209   : > { %v810_v45 = vpop.xlane.xlu1 %809 }
 0x20b   : > { %v812_v47 = vpop.xlane.xlu0 %811 }
 0x20d   : > { %v814_v49 = vpop.xlane.xlu1 %813 }
 0x20f   : > { %v816_v48 = vpop.xlane.xlu0 %815 }
 0x211   : > { %v818_v51 = vpop.xlane.xlu1 %817 }
 0x213   : > { %v820_v50 = vpop.xlane.xlu0 %819 }
 0x215   : > { %v822_v55 = vpop.xlane.xlu1 %821 }
 0x217   : > { %v824_v52 = vpop.xlane.xlu0 %823 }
 0x219   : > { %v826_v58 = vpop.xlane.xlu1 %825 }
 0x21b   : > { %v828_v46 = vpop.xlane.xlu0 %827 }
 0x21d   : > { %v830_v13 = vpop.xlane.xlu1 %829 }
 0x223   : > { %v839_v62 = vpop.permute.xlu0 %838 }
 0x224   : > { %v2390_v63 = vadd.f32 %v839_v62, %v800_v40  ;;  %v2392_v0 = vadd.f32 %v839_v62, %v802_v42  ;;  %v2394_v1 = vadd.f32 %v839_v62, %v804_v41  ;;  %v2396_v2 = vadd.f32 %v839_v62, %v806_v43 }
 0x225   : > { %v2398_v54 = vadd.f32 %v839_v62, %v808_v44  ;;  %v2400_v3 = vadd.f32 %v839_v62, %v810_v45  ;;  %v2402_v4 = vadd.f32 %v839_v62, %v812_v47  ;;  %v2404_v5 = vadd.f32 %v839_v62, %v814_v49 }
 0x226   : > { %v2406_v7 = vadd.f32 %v839_v62, %v816_v48  ;;  %v2408_v8 = vadd.f32 %v839_v62, %v818_v51  ;;  %v2410_v9 = vadd.f32 %v839_v62, %v820_v50  ;;  %v2412_v10 = vadd.f32 %v839_v62, %v822_v55 }
 0x227   : > { %v2414_v11 = vadd.f32 %v839_v62, %v824_v52  ;;  %v2416_v12 = vadd.f32 %v839_v62, %v826_v58  ;;  %v878_v14 = vrot.slane %v2390_v63, %v2385_v59  ;;  %v883_v15 = vrot.slane %v2392_v0, %v2388_v61 }
 0x228   : > { %v889_v16 = vrot.slane %v2394_v1, %v2385_v59  ;;  %v893_v17 = vrot.slane %v2396_v2, %v2388_v61  ;;  %v2426_v18 = vadd.f32 %v839_v62, %v828_v46  ;;  %v2428_v19 = vadd.f32 %v839_v62, %v830_v13 }
 0x229   : > { %v898_v20 = vrot.slane %v2398_v54, %v2385_v59  ;;  %v902_v21 = vrot.slane %v2400_v3, %v2388_v61  ;;  %v885_v22 = vsel %vm884_vm1, %v883_v15, %v878_v14  ;;  %v907_v24 = vrot.slane %v2402_v4, %v2385_v59 }
 0x22a   : > { %v894_v23 = vsel %vm884_vm1, %v893_v17, %v889_v16  ;;  %v911_v25 = vrot.slane %v2404_v5, %v2388_v61  ;;  %v916_v27 = vrot.slane %v2406_v7, %v2385_v59  ;;  %v920_v6 = vrot.slane %v2408_v8, %v2388_v61 }
 0x22b   : > { %v903_v26 = vsel %vm884_vm1, %v902_v21, %v898_v20  ;;  %v925_v28 = vrot.slane %v2410_v9, %v2385_v59  ;;  %v929_v29 = vrot.slane %v2412_v10, %v2388_v61  ;;  %v934_v30 = vrot.slane %v2414_v11, %v2385_v59 }
 0x22c   : > { %v938_v31 = vrot.slane %v2416_v12, %v2388_v61  ;;  %v950_v32 = vsel %vm949_vm2, %v894_v23, %v885_v22  ;;  %v912_v33 = vsel %vm884_vm1, %v911_v25, %v907_v24  ;;  %v943_v34 = vrot.slane %v2426_v18, %v2385_v59 }
 0x22d   : > { %v947_v35 = vrot.slane %v2428_v19, %v2388_v61  ;;  %v952_v36 = vsel %vm951_vm3, %v903_v26, %v950_v32  ;;  %v921_v37 = vsel %vm884_vm1, %v920_v6, %v916_v27  ;;  %v930_v39 = vsel %vm884_vm1, %v929_v29, %v925_v28 }
 0x22e   : > { %v954_v38 = vsel %vm953_vm4, %v912_v33, %v952_v36  ;;  %v939_v41 = vsel %vm884_vm1, %v938_v31, %v934_v30  ;;  %v983_v48 = vsub.s32 3, %v2327_v56  ;;  %v975_v50 = vsub.s32 1, %v2327_v56 }
 0x22f   : > { %v956_v40 = vsel %vm955_vm5, %v921_v37, %v954_v38  ;;  %v948_v43 = vsel %vm884_vm1, %v947_v35, %v943_v34  ;;  %v991_v62 = vsub.s32 5, %v2327_v56  ;;  %v995_v17 = vsub.s32 6, %v2327_v56 }
 0x230   : > { %v958_v42 = vsel %vm957_vm6, %v930_v39, %v956_v40  ;;  %v999_v24 = vsub.s32 7, %v2327_v56 }
 0x231   : > { %v960_v44 = vsel %vm959_vm7, %v939_v41, %v958_v42 }
 0x232   : > { %v962_v45 = vsel %vm961_vm8, %v948_v43, %v960_v44 }
 0x233   : > { %v965_v47 = vsel %vm964_vm9, %v962_v45, -inf }
 0x234   : > { %966 = vmax.xlane.f32.xlu1 %v965_v47 }
 0x2bd   : > { %v967_v49 = vpop.xlane.xlu1 %966 }
 0x2be   : > { %v972_v51 = vrot.slane %v967_v49, %v2331_v60  ;;  %v984_v55 = vrot.slane %v967_v49, %v983_v48  ;;  %v976_v57 = vrot.slane %v967_v49, %v975_v50  ;;  %v988_v13 = vrot.slane %v967_v49, %v987_v53 }
 0x2bf   : > { %v992_v20 = vrot.slane %v967_v49, %v991_v62  ;;  %v1000_v6 = vrot.slane %v967_v49, %v999_v24 }
 0x2c0   : > { %v1009_v52 = vsub.f32 %v2390_v63, %v972_v51  ;;  %v1010_v46 = vsub.f32 %v2392_v0, %v972_v51  ;;  %v1016_v14 = vsub.f32 %v2404_v5, %v984_v55  ;;  %v979_v63 = vsub.s32 2, %v2327_v56 }
 0x2c1   : > { %v1011_v15 = vsub.f32 %v2394_v1, %v976_v57  ;;  %v1018_v0 = vsub.f32 %v2408_v8, %v988_v13  ;;  %v1012_v23 = vsub.f32 %v2396_v2, %v976_v57  ;;  %v996_v1 = vrot.slane %v967_v49, %v995_v17 }
 0x2c2   : > { %v1025_v58 = vmul.f32 1.442695, %v1009_v52  ;;  %v1027_v16 = vmul.f32 1.442695, %v1010_v46  ;;  %v1039_v21 = vmul.f32 1.442695, %v1016_v14  ;;  %v980_v22 = vrot.slane %v967_v49, %v979_v63 }
 0x2c3   : > { %v1029_v5 = vmul.f32 1.442695, %v1011_v15  ;;  %v1020_v25 = vsub.f32 %v2412_v10, %v992_v20  ;;  %v1043_v26 = vmul.f32 1.442695, %v1018_v0  ;;  %v1031_v8 = vmul.f32 1.442695, %v1012_v23 }
 0x2c4   : > { %1811 = vpow2.f32 %v1025_v58  ;;  %v1013_v27 = vsub.f32 %v2398_v54, %v980_v22  ;;  %v1022_v2 = vsub.f32 %v2416_v12, %v996_v1  ;;  %v1014_v29 = vsub.f32 %v2400_v3, %v980_v22 }
 0x2c5   : > { %1813 = vpow2.f32 %v1027_v16  ;;  %v1047_v28 = vmul.f32 1.442695, %v1020_v25  ;;  %v1024_v10 = vsub.f32 %v2428_v19, %v1000_v6  ;;  %v1015_v32 = vsub.f32 %v2402_v4, %v984_v55 }
 0x2c6   : > { %1815 = vpow2.f32 %v1039_v21  ;;  %v1033_v30 = vmul.f32 1.442695, %v1013_v27  ;;  %v1051_v54 = vmul.f32 1.442695, %v1022_v2  ;;  %v1035_v33 = vmul.f32 1.442695, %v1014_v29 }
 0x2c7   : > { %1817 = vpow2.f32 %v1029_v5  ;;  %v1055_v3 = vmul.f32 1.442695, %v1024_v10  ;;  %v1017_v35 = vsub.f32 %v2406_v7, %v988_v13  ;;  %v1037_v36 = vmul.f32 1.442695, %v1015_v32 }
 0x2c8   : > { %1819 = vpow2.f32 %v1043_v26  ;;  %v1019_v19 = vsub.f32 %v2410_v9, %v992_v20  ;;  %v1021_v40 = vsub.f32 %v2414_v11, %v996_v1  ;;  %v1023_v43 = vsub.f32 %v2426_v18, %v1000_v6 }
 0x2c9   : > { %1821 = vpow2.f32 %v1031_v8  ;;  %v1041_v38 = vmul.f32 1.442695, %v1017_v35 }
 0x2ca   : > { %1823 = vpow2.f32 %v1047_v28  ;;  %v1045_v41 = vmul.f32 1.442695, %v1019_v19  ;;  %v1049_v44 = vmul.f32 1.442695, %v1021_v40  ;;  %v1053_v47 = vmul.f32 1.442695, %v1023_v43 }
 0x2cb   : > { %1825 = vpow2.f32 %v1033_v30 }
 0x2cc   : > { %1827 = vpow2.f32 %v1051_v54 }
 0x2cd   : > { %1829 = vpow2.f32 %v1035_v33 }
 0x2ce   : > { %1831 = vpow2.f32 %v1055_v3 }
 0x2cf   : > { %1833 = vpow2.f32 %v1037_v36 }
 0x2d0   : > { %1835 = vpow2.f32 %v1041_v38 }
 0x2d1   : > { %v2502_v31 = vpop.eup %1811  ;;  %1837 = vpow2.f32 %v1045_v41 }
 0x2d2   : > { %1074 = vperm.xlu1 %1778, %v2502_v31   ;;  %v2507_v34 = vpop.eup %1813  ;;  %1839 = vpow2.f32 %v1049_v44 }
 0x2d3   : > { %v2510_v12 = vpop.eup %1815  ;;  %1841 = vpow2.f32 %v1053_v47 }
 0x2d4   : > { %v2513_v37 = vpop.eup %1817  ;;  %1095 = vperm.xlu0 %1777, %v2510_v12  }
 0x2d5   : > { %v2517_v4 = vpop.eup %1819 }
 0x2d6   : > { %1077 = vperm.xlu1 %1778, %v2507_v34   ;;  %v2520_v39 = vpop.eup %1821 }
 0x2d7   : > { %v2524_v7 = vpop.eup %1823 }
 0x2d8   : > { %1101 = vperm.xlu0 %1777, %v2517_v4   ;;  %v2527_v42 = vpop.eup %1825 }
 0x2d9   : > { %v2531_v9 = vpop.eup %1827 }
 0x2da   : > { %1080 = vperm.xlu1 %1778, %v2513_v37   ;;  %v2534_v45 = vpop.eup %1829 }
 0x2db   : > { %v2538_v11 = vpop.eup %1831 }
 0x2dc   : > { %1107 = vperm.xlu0 %1777, %v2524_v7   ;;  %v2540_v49 = vpop.eup %1833 }
 0x2dd   : > { %v2544_v18 = vpop.eup %1835 }
 0x2de   : > { %1083 = vperm.xlu1 %1778, %v2520_v39   ;;  %v2547_v51 = vpop.eup %1837 }
 0x2df   : > { %v2550_v52 = vpop.eup %1839 }
 0x2e0   : > { %1113 = vperm.xlu0 %1777, %v2531_v9   ;;  %v1842_v55 = vpop.eup %1841 }
 0x2e2   : > { %1086 = vperm.xlu1 %1778, %v2527_v42  }
 0x2e4   : > { %1119 = vperm.xlu0 %1777, %v2538_v11  }
 0x2e6   : > { %1089 = vperm.xlu1 %1778, %v2534_v45  }
 0x2ea   : > { %1092 = vperm.xlu1 %1778, %v2540_v49  }
 0x2ee   : > { %1098 = vperm.xlu1 %1778, %v2544_v18  }
 0x2f2   : > { %1104 = vperm.xlu1 %1778, %v2547_v51  }
 0x2f6   : > { %1110 = vperm.xlu1 %1778, %v2550_v52  }
 0x2fa   : > { %1116 = vperm.xlu1 %1778, %v1842_v55  }
 0x34d   : > { %v1075_v57 = vpop.permute.xlu1 %1074 }
 0x34e   : > { %v1124_v29 = vrot.slane %v1075_v57, %v2385_v59 }
 0x34f   : > { %v1096_v14 = vpop.permute.xlu0 %1095 }
 0x350   : > { %v1155_v28 = vrot.slane %v1096_v14, %v2388_v61 }
 0x351   : > { %v1078_v46 = vpop.permute.xlu1 %1077 }
 0x352   : > { %v1128_v26 = vrot.slane %v1078_v46, %v2388_v61 }
 0x353   : > { %v1102_v16 = vpop.permute.xlu0 %1101 }
 0x354   : > { %v1164_v54 = vrot.slane %v1102_v16, %v2388_v61  ;;  %v1129_v3 = vsel %vm884_vm1, %v1128_v26, %v1124_v29 }
 0x355   : > { %v1081_v58 = vpop.permute.xlu1 %1080 }
 0x356   : > { %v1133_v27 = vrot.slane %v1081_v58, %v2385_v59 }
 0x357   : > { %v1108_v21 = vpop.permute.xlu0 %1107 }
 0x358   : > { %v1173_v35 = vrot.slane %v1108_v21, %v2388_v61 }
 0x359   : > { %v1084_v13 = vpop.permute.xlu1 %1083 }
 0x35a   : > { %v1137_v23 = vrot.slane %v1084_v13, %v2388_v61 }
 0x35b   : > { %v1114_v5 = vpop.permute.xlu0 %1113 }
 0x35c   : > { %v1138_v30 = vsel %vm884_vm1, %v1137_v23, %v1133_v27  ;;  %v1182_v38 = vrot.slane %v1114_v5, %v2388_v61 }
 0x35d   : > { %v1087_v15 = vpop.permute.xlu1 %1086  ;;  %v1193_v40 = vsel %vm949_vm2, %v1138_v30, %v1129_v3 }
 0x35e   : > { %v1142_v6 = vrot.slane %v1087_v15, %v2385_v59 }
 0x35f   : > { %v1120_v41 = vpop.permute.xlu0 %1119 }
 0x360   : > { %v1191_v13 = vrot.slane %v1120_v41, %v2388_v61 }
 0x361   : > { %v1090_v20 = vpop.permute.xlu1 %1089 }
 0x362   : > { %v1146_v1 = vrot.slane %v1090_v20, %v2388_v61 }
 0x364   : > { %v1147_v32 = vsel %vm884_vm1, %v1146_v1, %v1142_v6 }
 0x365   : > { %v1093_v0 = vpop.permute.xlu1 %1092  ;;  %v1194_v44 = vsel %vm951_vm3, %v1147_v32, %v1193_v40 }
 0x366   : > { %v1151_v8 = vrot.slane %v1093_v0, %v2385_v59 }
 0x368   : > { %v1156_v36 = vsel %vm884_vm1, %v1155_v28, %v1151_v8 }
 0x369   : > { %v1099_v22 = vpop.permute.xlu1 %1098  ;;  %v1195_v57 = vsel %vm953_vm4, %v1156_v36, %v1194_v44 }
 0x36a   : > { %v1160_v2 = vrot.slane %v1099_v22, %v2385_v59 }
 0x36c   : > { %v1165_v43 = vsel %vm884_vm1, %v1164_v54, %v1160_v2 }
 0x36d   : > { %v1105_v25 = vpop.permute.xlu1 %1104  ;;  %v1196_v14 = vsel %vm955_vm5, %v1165_v43, %v1195_v57 }
 0x36e   : > { %v1169_v10 = vrot.slane %v1105_v25, %v2385_v59 }
 0x370   : > { %v1174_v47 = vsel %vm884_vm1, %v1173_v35, %v1169_v10 }
 0x371   : > { %v1111_v33 = vpop.permute.xlu1 %1110  ;;  %v1197_v16 = vsel %vm957_vm6, %v1174_v47, %v1196_v14 }
 0x372   : > { %v1178_v19 = vrot.slane %v1111_v33, %v2385_v59 }
 0x374   : > { %v1183_v46 = vsel %vm884_vm1, %v1182_v38, %v1178_v19 }
 0x375   : > { %v1117_v58 = vpop.permute.xlu1 %1116  ;;  %v1198_v0 = vsel %vm959_vm7, %v1183_v46, %v1197_v16 }
 0x376   : > { %v1187_v15 = vrot.slane %v1117_v58, %v2385_v59 }
 0x378   : > { %v1192_v20 = vsel %vm884_vm1, %v1191_v13, %v1187_v15 }
 0x379   : > { %v1199_v21 = vsel %vm961_vm8, %v1192_v20, %v1198_v0 }
 0x37a   : > { %v1201_v22 = vsel %vm964_vm9, %v1199_v21, 0.0 }
 0x37b   : > { %1202 = vadd.xlane.f32.xlu1 %v1201_v22 }
 0x404   : > { %v1203_v23 = vpop.xlane.xlu1 %1202 }
 0x405   : > { %1843 = vrcp.f32 %v1203_v23 }
 0x412   : > { %v1844_v5 = vpop.eup %1843 }
 0x413   : > { %v1225_v1 = vrot.slane %v1844_v5, %v987_v53  ;;  %v1209_v25 = vrot.slane %v1844_v5, %v2331_v60  ;;  %v1237_v8 = vrot.slane %v1844_v5, %v999_v24  ;;  %v1213_v28 = vrot.slane %v1844_v5, %v975_v50 }
 0x415   : > { %v1255_v26 = vmul.f32 %v2517_v4, %v1225_v1  ;;  %v1246_v27 = vmul.f32 %v2502_v31, %v1209_v25  ;;  %v1260_v6 = vmul.f32 %v1842_v55, %v1237_v8  ;;  %v1247_v2 = vmul.f32 %v2507_v34, %v1209_v25 }
 0x416   : > { %v1248_v53 = vmul.f32 %v2513_v37, %v1213_v28  ;;  %v1249_v60 = vmul.f32 %v2520_v39, %v1213_v28  ;;  %v1217_v31 = vrot.slane %v1844_v5, %v979_v63  ;;  %v1221_v34 = vrot.slane %v1844_v5, %v983_v48 }
 0x417   : > { %1306 = vperm.xlu1 %1778, %v1255_v26   ;;  %1279 = vperm.xlu0 %1777, %v1246_v27   ;;  %v1254_v39 = vmul.f32 %v2544_v18, %v1225_v1  ;;  %v1229_v63 = vrot.slane %v1844_v5, %v991_v62  ;;  %v1233_v48 = vrot.slane %v1844_v5, %v995_v17 }
 0x418   : > { %v1250_v24 = vmul.f32 %v2527_v42, %v1217_v31  ;;  %v1251_v4 = vmul.f32 %v2534_v45, %v1217_v31  ;;  %v1252_v50 = vmul.f32 %v2540_v49, %v1221_v34  ;;  %v1253_v37 = vmul.f32 %v2510_v12, %v1221_v34 }
 0x419   : > { %v1256_v42 = vmul.f32 %v2547_v51, %v1229_v63  ;;  %v1257_v45 = vmul.f32 %v2524_v7, %v1229_v63  ;;  %v1258_v49 = vmul.f32 %v2550_v52, %v1233_v48  ;;  %v1259_v12 = vmul.f32 %v2531_v9, %v1233_v48 }
 0x41a   : > { %v1261_v18 = vmul.f32 %v2538_v11, %v1237_v8 }
 0x41b   : > { %1321 = vperm.xlu1 %1778, %v1260_v6   ;;  %1282 = vperm.xlu0 %1777, %v1247_v2  }
 0x41f   : > { %1285 = vperm.xlu0 %1777, %v1248_v53  }
 0x423   : > { %1288 = vperm.xlu0 %1777, %v1249_v60  }
 0x427   : > { %1291 = vperm.xlu0 %1777, %v1250_v24  }
 0x42b   : > { %1294 = vperm.xlu0 %1777, %v1251_v4  }
 0x42f   : > { %1297 = vperm.xlu0 %1777, %v1252_v50  }
 0x433   : > { %1300 = vperm.xlu0 %1777, %v1253_v37  }
 0x437   : > { %1303 = vperm.xlu0 %1777, %v1254_v39  }
 0x43b   : > { %1309 = vperm.xlu0 %1777, %v1256_v42  }
 0x43f   : > { %1312 = vperm.xlu0 %1777, %v1257_v45  }
 0x443   : > { %1315 = vperm.xlu0 %1777, %v1258_v49  }
 0x447   : > { %1318 = vperm.xlu0 %1777, %v1259_v12  }
 0x44b   : > { %1324 = vperm.xlu0 %1777, %v1261_v18  }
 0x492   : > { %v1280_v62 = vpop.permute.xlu0 %1279  ;;  %v1307_v33 = vpop.permute.xlu1 %1306 }
 0x493   : > { %v1329_v40 = vrot.slane %v1280_v62, %v2385_v59  ;;  %v1369_v47 = vrot.slane %v1307_v33, %v2388_v61 }
 0x496   : > { %v1283_v55 = vpop.permute.xlu0 %1282  ;;  %v1322_v16 = vpop.permute.xlu1 %1321 }
 0x497   : > { %v1333_v11 = vrot.slane %v1283_v55, %v2388_v61  ;;  %v1392_v26 = vrot.slane %v1322_v16, %v2385_v59 }
 0x499   : > { %v1334_v58 = vsel %vm884_vm1, %v1333_v11, %v1329_v40 }
 0x49a   : > { %v1286_v29 = vpop.permute.xlu0 %1285 }
 0x49b   : > { %v1338_v35 = vrot.slane %v1286_v29, %v2385_v59 }
 0x49e   : > { %v1289_v51 = vpop.permute.xlu0 %1288 }
 0x49f   : > { %v1342_v52 = vrot.slane %v1289_v51, %v2388_v61 }
 0x4a1   : > { %v1343_v41 = vsel %vm884_vm1, %v1342_v52, %v1338_v35 }
 0x4a2   : > { %v1292_v30 = vpop.permute.xlu0 %1291  ;;  %v1398_v20 = vsel %vm949_vm2, %v1343_v41, %v1334_v58 }
 0x4a3   : > { %v1347_v19 = vrot.slane %v1292_v30, %v2385_v59 }
 0x4a6   : > { %v1295_v10 = vpop.permute.xlu0 %1294 }
 0x4a7   : > { %v1351_v9 = vrot.slane %v1295_v10, %v2388_v61 }
 0x4a9   : > { %v1352_v57 = vsel %vm884_vm1, %v1351_v9, %v1347_v19 }
 0x4aa   : > { %v1298_v7 = vpop.permute.xlu0 %1297  ;;  %v1399_v22 = vsel %vm951_vm3, %v1352_v57, %v1398_v20 }
 0x4ab   : > { %v1356_v43 = vrot.slane %v1298_v7, %v2385_v59 }
 0x4ae   : > { %v1301_v54 = vpop.permute.xlu0 %1300 }
 0x4af   : > { %v1360_v36 = vrot.slane %v1301_v54, %v2388_v61 }
 0x4b1   : > { %v1361_v13 = vsel %vm884_vm1, %v1360_v36, %v1356_v43 }
 0x4b2   : > { %v1304_v56 = vpop.permute.xlu0 %1303  ;;  %v1400_v5 = vsel %vm953_vm4, %v1361_v13, %v1399_v22 }
 0x4b3   : > { %v1365_v38 = vrot.slane %v1304_v56, %v2385_v59 }
 0x4b5   : > { %v1370_v0 = vsel %vm884_vm1, %v1369_v47, %v1365_v38 }
 0x4b6   : > { %v1310_v17 = vpop.permute.xlu0 %1309  ;;  %v1401_v27 = vsel %vm955_vm5, %v1370_v0, %v1400_v5 }
 0x4b7   : > { %v1374_v14 = vrot.slane %v1310_v17, %v2385_v59 }
 0x4ba   : > { %v1313_v32 = vpop.permute.xlu0 %1312 }
 0x4bb   : > { %v1378_v44 = vrot.slane %v1313_v32, %v2388_v61 }
 0x4bd   : > { %v1379_v23 = vsel %vm884_vm1, %v1378_v44, %v1374_v14 }
 0x4be   : > { %v1316_v3 = vpop.permute.xlu0 %1315  ;;  %v1402_v6 = vsel %vm957_vm6, %v1379_v23, %v1401_v27 }
 0x4bf   : > { %v1383_v21 = vrot.slane %v1316_v3, %v2385_v59 }
 0x4c2   : > { %v1319_v46 = vpop.permute.xlu0 %1318 }
 0x4c3   : > { %v1387_v15 = vrot.slane %v1319_v46, %v2388_v61 }
 0x4c5   : > { %v1388_v1 = vsel %vm884_vm1, %v1387_v15, %v1383_v21 }
 0x4c6   : > { %v1325_v25 = vpop.permute.xlu0 %1324  ;;  %v1403_v2 = vsel %vm959_vm7, %v1388_v1, %v1402_v6 }
 0x4c7   : > { %v1396_v8 = vrot.slane %v1325_v25, %v2388_v61 }
 0x4c9   : > { %v1397_v28 = vsel %vm884_vm1, %v1396_v8, %v1392_v26 }
 0x4ca   : > { %v1404_v53 = vsel %vm961_vm8, %v1397_v28, %v1403_v2 }
 0x4cb   : > { %1406 = vst.msk [vmem:[%s365_s14] sm:$0xff] %vm964_vm9, %v1404_v53 }
 0x4cc   : > { %1966 = shalt.err (!%p1963_p4)
}
 0x4cd   : > { %s1967_s19 = scalar_lea.hbm %s2651_s6, 128  ;;  %s1971_s8 = scalar_lea.hbm %s2697_s7, 256 }
 0x4ce   : > { %p1968_p5 = scmp.ne.s32.totalorder %s2651_s6, %s1967_s19  ;;  %p1972_p2 = scmp.lt.s32.totalorder %s2651_s6, %s2697_s7 }
 0x4cf   : > { %p1973_p6 = scmp.lt.s32.totalorder %s1971_s8, %s1967_s19 }
 0x4d0   : > { %p1969_p7 = pnand %p1968_p5, %p2722_p10 }
 0x4d1   : > { %p1974_p12 = por %p1973_p6, %p1972_p2 }
 0x4d2   : > { %p1970_p8 = pneg %p1969_p7 }
 0x4d4   : > { %p1975_p0 = pnand %p1974_p12, %p1970_p8 }
 0x4d6   : > { %1978 = shalt.err (!%p1975_p0)
}
 0x4d7   : > { %1711 = dma.vmem_to_hbm [thread:$0]  (%p2722_p10), %s1422_s25, 128, %s2651_s6, %s1408_s13  }
 0x4d8 PF: > { %s1433_s16 = sand.u32 1, %s2017_s26   ;;  %p2723_p3 = scmp.ne.s32.totalorder %s2706_s9, 0 }
 0x4d9   : > { %p2724_p11 = scmp.ge.s32.totalorder %s2029_s29, 2  ;;  %s1434_s21 = scalar_lea.sflag [#allocation5], %s1433_s16 }
 0x4db   : > { %p1728_p9 = pnand %p2724_p11, %p2723_p3 }
 0x4dd   : > { %p1729_p13 = pneg %p1728_p9 }
 0x4df   : > { %2012 = dma.done.wait (%p1729_p13), %s1434_s21, 128  }
 0x4e0   : > { %2014 = vsyncadd (%p1729_p13), %s1434_s21, 4294967168  ;;  %p26_p1 = scmp.ge.s32.totalorder %s2163_s24, 4   ;;  %s2725_s26 = smov %s2021_s27 }
 0x4e1   : > { %s2726_s27 = smov %s2025_s28  ;;  %s2727_s28 = smov %s2179_s12 }
 0x4e2   : > { %s2728_s29 = smov %s2163_s24  ;;  %28 = sbr.rel (!%p26_p1) target bundleno = 11 (0xb), region = 114 }
 0x4e7   :  { %1439 = vsyncpa [#allocation4], 1 }
 0x4e8   :  { %1441 = vsyncpa [#allocation4 + $0x1], 1 }
 0x4e9   :  { %1442 = vsyncpa [#allocation7], 1 }
 0x4ea   :  { %1444 = vsyncpa [#allocation7 + $0x1], 1 }
 0x4eb   :  { %1445 = vsyncpa [#allocation10], 1 }
 0x4ec   :  { %1446 = vsyncpa [#allocation5], 1 }
 0x4ed   :  { %1448 = vsyncpa [#allocation5 + $0x1], 1 }

</bundles_post_ra>
